<compile_context>
chip_gen: v6e
topology: v6e:2x2x1
jax: 0.10.0
libtpu: 0.0.40
codegen_flags: <defaults>
</compile_context>

<pallas_src>
import math

import jax
import jax.numpy as jnp
from jax.experimental import pallas as pl
from jax.experimental.pallas import tpu as pltpu


_VMEM_LIMIT = 32 * 1024 * 1024  # safe on v5e/v6e/v7x; tiles below use far less


def _largest_tile(n, target, align):
    """Largest multiple of `align` that divides n and is <= target, else n (full)."""
    if n <= target:
        return n
    start = (target // align) * align
    for t in range(start, 0, -align):
        if n % t == 0:
            return t
    return n


# ---------------------------------------------------------------------------
# Kernels
# ---------------------------------------------------------------------------

def _kv_proj_kernel(x_ref, w_ref, b_ref, kT_ref, v_ref):
    """Fused k/v linear: (rt, C) @ (C, 2C) + b -> kT (C, rt) bf16 and v (rt, C) bf16."""
    C = v_ref.shape[-1]
    x = x_ref[0].astype(jnp.bfloat16)                               # (rt, C)
    y = jnp.dot(x, w_ref[...], preferred_element_type=jnp.float32) + b_ref[...]
    # One-time transpose of k here (XLU slack) keeps the attention matmuls NN-form.
    kT_ref[0] = y[:, :C].T.astype(kT_ref.dtype)                     # (C, rt)
    v_ref[0] = y[:, C:].astype(v_ref.dtype)                         # (rt, C)


def _attn_proj_single_kernel(x1_ref, kT_ref, v_ref, wq_ref, bq_ref,
                             wp_ref, bp_ref, o_ref):
    """Specialized path (tk == N): q-proj + full softmax attention + out-proj."""
    x1 = x1_ref[0].astype(jnp.bfloat16)                             # (tq, C)
    q = jnp.dot(x1, wq_ref[...],
                preferred_element_type=jnp.float32) + bq_ref[...]   # scaled q, f32
    s = jnp.dot(q.astype(jnp.bfloat16), kT_ref[0],
                preferred_element_type=jnp.float32)                 # (tq, N)
    m = s.max(axis=-1, keepdims=True)
    p = jnp.exp(s - m)
    l = p.sum(axis=-1, keepdims=True)
    out = jnp.dot(p.astype(jnp.bfloat16), v_ref[0],
                  preferred_element_type=jnp.float32)               # (tq, C)
    out = out * pl.reciprocal(l, approx=True)
    y = jnp.dot(out.astype(jnp.bfloat16), wp_ref[...],
                preferred_element_type=jnp.float32) + bp_ref[...]
    o_ref[0] = y.astype(o_ref.dtype)


def _flash_attn_proj_kernel(x1_ref, kT_ref, v_ref, wq_ref, bq_ref,
                            wp_ref, bp_ref, o_ref,
                            q_sc, m_sc, l_sc, acc_sc):
    """General path (tk < N): q-proj + online-softmax flash attention + out-proj."""
    ki = pl.program_id(2)

    @pl.when(ki == 0)
    def _():
        x1 = x1_ref[0].astype(jnp.bfloat16)                         # (tq, C)
        q = jnp.dot(x1, wq_ref[...],
                    preferred_element_type=jnp.float32) + bq_ref[...]
        q_sc[...] = q.astype(q_sc.dtype)
        m_sc[...] = jnp.full(m_sc.shape, -jnp.inf, m_sc.dtype)
        l_sc[...] = jnp.zeros(l_sc.shape, l_sc.dtype)
        acc_sc[...] = jnp.zeros(acc_sc.shape, acc_sc.dtype)

    kT = kT_ref[0]                                                  # (C, tk) bf16
    v = v_ref[0]                                                    # (tk, C) bf16
    s = jnp.dot(q_sc[...], kT, preferred_element_type=jnp.float32)  # (tq, tk)

    m_prev = m_sc[...]
    m_new = jnp.maximum(m_prev, s.max(axis=-1, keepdims=True))
    alpha = jnp.exp(m_prev - m_new)
    p = jnp.exp(s - m_new)
    l_sc[...] = alpha * l_sc[...] + p.sum(axis=-1, keepdims=True)
    acc_sc[...] = alpha * acc_sc[...] + jnp.dot(
        p.astype(jnp.bfloat16), v, preferred_element_type=jnp.float32)
    m_sc[...] = m_new

    @pl.when(ki == pl.num_programs(2) - 1)
    def _():
        out = acc_sc[...] * pl.reciprocal(l_sc[...], approx=True)
        y = jnp.dot(out.astype(jnp.bfloat16), wp_ref[...],
                    preferred_element_type=jnp.float32) + bp_ref[...]
        o_ref[0] = y.astype(o_ref.dtype)


# ---------------------------------------------------------------------------
# pallas_call wrappers
# ---------------------------------------------------------------------------

def _kv_projection(x2, wkv, bkv, row_target=512):
    """x2: (B, N, C) f32 -> kT (B, C, N) bf16, v (B, N, C) bf16."""
    B, N, C = x2.shape
    rt = _largest_tile(N, row_target, 128)  # rt is the lane dim of the kT tile
    return pl.pallas_call(
        _kv_proj_kernel,
        out_shape=(jax.ShapeDtypeStruct((B, C, N), jnp.bfloat16),
                   jax.ShapeDtypeStruct((B, N, C), jnp.bfloat16)),
        grid=(B, N // rt),
        in_specs=[
            pl.BlockSpec((1, rt, C), lambda b, i: (b, i, 0)),
            pl.BlockSpec((C, 2 * C), lambda b, i: (0, 0)),
            pl.BlockSpec((1, 2 * C), lambda b, i: (0, 0)),
        ],
        out_specs=(pl.BlockSpec((1, C, rt), lambda b, i: (b, 0, i)),
                   pl.BlockSpec((1, rt, C), lambda b, i: (b, i, 0))),
        compiler_params=pltpu.CompilerParams(
            dimension_semantics=("parallel", "parallel"),
            vmem_limit_bytes=_VMEM_LIMIT),
    )(x2, wkv, bkv)


def _attention_proj(x1, kT, v, wq, bq, wp, bp, out_dtype,
                    q_tile=256, k_tile=512):
    B, N, C = x1.shape
    tq = _largest_tile(N, q_tile, 16)
    if B == 1 and tq == N and N >= 32:
        # Keep >= 2 "parallel" grid blocks so both v7x TensorCores get work.
        tq = _largest_tile(N, max(16, N // 2), 16)
    tk = _largest_tile(N, k_tile, 128)      # tk is the lane dim of the kT tile

    weight_specs_single = [
        pl.BlockSpec((C, C), lambda b, qi: (0, 0)),           # wq (scaled) bf16
        pl.BlockSpec((1, C), lambda b, qi: (0, 0)),           # bq (scaled) f32
        pl.BlockSpec((C, C), lambda b, qi: (0, 0)),           # wp bf16
        pl.BlockSpec((1, C), lambda b, qi: (0, 0)),           # bp f32
    ]

    if tk == N:
        # Single key tile: whole softmax in one pass, no online bookkeeping.
        return pl.pallas_call(
            _attn_proj_single_kernel,
            out_shape=jax.ShapeDtypeStruct((B, N, C), out_dtype),
            grid=(B, N // tq),
            in_specs=[
                pl.BlockSpec((1, tq, C), lambda b, qi: (b, qi, 0)),   # fmap1 tile
                pl.BlockSpec((1, C, N), lambda b, qi: (b, 0, 0)),     # k^T (all keys)
                pl.BlockSpec((1, N, C), lambda b, qi: (b, 0, 0)),     # v   (all keys)
            ] + weight_specs_single,
            out_specs=pl.BlockSpec((1, tq, C), lambda b, qi: (b, qi, 0)),
            compiler_params=pltpu.CompilerParams(
                dimension_semantics=("parallel", "parallel"),
                vmem_limit_bytes=_VMEM_LIMIT),
        )(x1, kT, v, wq, bq, wp, bp)

    # General flash path with online softmax over key tiles.
    return pl.pallas_call(
        _flash_attn_proj_kernel,
        out_shape=jax.ShapeDtypeStruct((B, N, C), out_dtype),
        grid=(B, N // tq, N // tk),
        in_specs=[
            pl.BlockSpec((1, tq, C), lambda b, qi, ki: (b, qi, 0)),   # fmap1 tile
            pl.BlockSpec((1, C, tk), lambda b, qi, ki: (b, 0, ki)),   # k^T tile
            pl.BlockSpec((1, tk, C), lambda b, qi, ki: (b, ki, 0)),   # v tile
            pl.BlockSpec((C, C), lambda b, qi, ki: (0, 0)),           # wq (scaled)
            pl.BlockSpec((1, C), lambda b, qi, ki: (0, 0)),           # bq (scaled)
            pl.BlockSpec((C, C), lambda b, qi, ki: (0, 0)),           # wp
            pl.BlockSpec((1, C), lambda b, qi, ki: (0, 0)),           # bp
        ],
        out_specs=pl.BlockSpec((1, tq, C), lambda b, qi, ki: (b, qi, 0)),
        scratch_shapes=[
            pltpu.VMEM((tq, C), jnp.bfloat16),   # projected, scaled q tile
            pltpu.VMEM((tq, 1), jnp.float32),    # running max m
            pltpu.VMEM((tq, 1), jnp.float32),    # running denom l
            pltpu.VMEM((tq, C), jnp.float32),    # output accumulator
        ],
        compiler_params=pltpu.CompilerParams(
            dimension_semantics=("parallel", "parallel", "arbitrary"),
            vmem_limit_bytes=_VMEM_LIMIT),
    )(x1, kT, v, wq, bq, wp, bp)


# ---------------------------------------------------------------------------
# Module forward
# ---------------------------------------------------------------------------

def global_attention(fmap1, fmap2, params, mask=None, scale=None, use_pallas=True):
    """GlobalAttention.forward: fmap1, fmap2 (B, H, W, C) -> (B, H, W, C)."""
    # TODO(synk): the optional additive attention `mask` path is not implemented.
    assert mask is None, "mask path not implemented"
    B, H, W, C = fmap1.shape
    N = H * W
    scale = scale if scale is not None else C ** (-0.5)
    wq, bq = params["q"]
    wk, bk = params["k"]
    wv, bv = params["v"]
    wp, bp = params["proj"]

    if not use_pallas:  # pure-JAX f32 reference path
        hp = jax.lax.Precision.HIGHEST
        x1 = fmap1.reshape(B, N, C)
        x2 = fmap2.reshape(B, N, C)
        q = jnp.einsum("bnc,cd->bnd", x1, wq, precision=hp) + bq
        k = jnp.einsum("bnc,cd->bnd", x2, wk, precision=hp) + bk
        v = jnp.einsum("bnc,cd->bnd", x2, wv, precision=hp) + bv
        attn = jax.nn.softmax(
            jnp.einsum("bnc,bmc->bnm", q * scale, k, precision=hp), axis=-1)
        x = jnp.einsum("bnm,bmc->bnc", attn, v, precision=hp)
        x = jnp.einsum("bnc,cd->bnd", x, wp, precision=hp) + bp
        return x.reshape(B, H, W, C)

    # One-time weight prep: fold the softmax scale into the q projection (scales
    # N*C elements implicitly instead of N*N logits) and fuse the k/v weights so
    # both projections come out of a single pallas_call.
    wq_s = (wq * scale).astype(jnp.bfloat16)
    bq_s = (bq * scale).reshape(1, C).astype(jnp.float32)
    wkv = jnp.concatenate([wk, wv], axis=1).astype(jnp.bfloat16)
    bkv = jnp.concatenate([bk, bv]).reshape(1, 2 * C).astype(jnp.float32)
    wp_b = wp.astype(jnp.bfloat16)
    bp2 = bp.reshape(1, C).astype(jnp.float32)

    kT, v_all = _kv_projection(fmap2.reshape(B, N, C), wkv, bkv)
    out = _attention_proj(fmap1.reshape(B, N, C), kT, v_all,
                          wq_s, bq_s, wp_b, bp2, fmap1.dtype)
    return out.reshape(B, H, W, C)


# ---------------------------------------------------------------------------
# Deterministic synthetic parameters + driver
# ---------------------------------------------------------------------------

def init_params(key, dim):
    def linear(k, cin, cout):
        kw, kb = jax.random.split(k)
        w = jax.random.normal(kw, (cin, cout), jnp.float32) / math.sqrt(cin)
        b = jax.random.normal(kb, (cout,), jnp.float32) * 0.02
        return w, b

    kq, kk, kv_, kp = jax.random.split(key, 4)
    return {
        "q": linear(kq, dim, dim),
        "k": linear(kk, dim, dim),
        "v": linear(kv_, dim, dim),
        "proj": linear(kp, dim, dim),
    }


if __name__ == "__main__":
    B, H, W, C = 2, 16, 16, 128   # N=256 -> single-key-tile fast path, tq=256
    key = jax.random.PRNGKey(0)
    k1, k2, kpar = jax.random.split(key, 3)
    fmap1 = jax.random.normal(k1, (B, H, W, C), jnp.float32) * 0.5
    fmap2 = jax.random.normal(k2, (B, H, W, C), jnp.float32) * 0.5
    params = init_params(kpar, C)

    out = global_attention(fmap1, fmap2, params, use_pallas=True)
    jax.block_until_ready(out)

    ref = global_attention(fmap1, fmap2, params, use_pallas=False)
    assert out.shape == (B, H, W, C)
    err = float(jnp.max(jnp.abs(out - ref)) / (1.0 + jnp.max(jnp.abs(ref))))
    # bf16 MXU operands + approx reciprocal vs. f32 HIGHEST reference.
    assert err < 2e-2, f"max rel err {err}"

    print("KERNEL_OK")
</pallas_src>

<mosaic_0001>
module attributes {stable_mosaic.version = 11 : i64} {
  func.func @_kv_proj_kernel(%arg0: i32, %arg1: i32, %arg2: memref<1x256x128xf32, #tpu.memory_space<vmem>>, %arg3: memref<128x256xbf16, #tpu.memory_space<vmem>>, %arg4: memref<1x256xf32, #tpu.memory_space<vmem>>, %arg5: memref<1x128x256xbf16, #tpu.memory_space<vmem>>, %arg6: memref<1x256x128xbf16, #tpu.memory_space<vmem>>) attributes {dimension_semantics = [#tpu.dimension_semantics<parallel>, #tpu.dimension_semantics<parallel>], iteration_bounds = array<i64: 2, 1>, scalar_prefetch = 0 : i64, scratch_operands = 0 : i64, tpu.core_type = #tpu.core_type<tc>, window_params = [{transform_indices = @transform_0, window_bounds = array<i64: 1, 256, 128>}, {pipeline_mode = #tpu.pipeline_mode<synchronous>, transform_indices = @transform_1, window_bounds = array<i64: 128, 256>}, {pipeline_mode = #tpu.pipeline_mode<synchronous>, transform_indices = @transform_2, window_bounds = array<i64: 1, 256>}, {transform_indices = @transform_3, window_bounds = array<i64: 1, 128, 256>}, {transform_indices = @transform_4, window_bounds = array<i64: 1, 256, 128>}]} {
    %c0 = arith.constant 0 : index
    %c0_0 = arith.constant 0 : index
    %c0_1 = arith.constant 0 : index
    %0 = vector.load %arg2[%c0, %c0_0, %c0_1] : memref<1x256x128xf32, #tpu.memory_space<vmem>>, vector<1x256x128xf32>
    %1 = vector.shape_cast %0 : vector<1x256x128xf32> to vector<256x128xf32>
    %2 = arith.truncf %1 : vector<256x128xf32> to vector<256x128xbf16>
    %c0_2 = arith.constant 0 : index
    %c0_3 = arith.constant 0 : index
    %3 = vector.load %arg3[%c0_2, %c0_3] : memref<128x256xbf16, #tpu.memory_space<vmem>>, vector<128x256xbf16>
    %cst = arith.constant dense<0.000000e+00> : vector<256x256xf32>
    %4 = tpu.matmul %2, %3, %cst {dimension_numbers = #tpu.dot_dimension_numbers<[1], [0], [0], [1], [0, 0, 1, 1], [], []>} : vector<256x128xbf16>, vector<128x256xbf16>, vector<256x256xf32> -> vector<256x256xf32>
    %c0_4 = arith.constant 0 : index
    %c0_5 = arith.constant 0 : index
    %5 = vector.load %arg4[%c0_4, %c0_5] : memref<1x256xf32, #tpu.memory_space<vmem>>, vector<1x256xf32>
    %6 = vector.broadcast %5 : vector<1x256xf32> to vector<256x256xf32>
    %7 = arith.addf %4, %6 : vector<256x256xf32>
    %8 = vector.extract_strided_slice %7 {offsets = [0, 0], sizes = [256, 128], strides = [1, 1]} : vector<256x256xf32> to vector<256x128xf32>
    %9 = tpu.transpose %8, [1, 0] : vector<256x128xf32> -> vector<128x256xf32>
    %10 = arith.truncf %9 : vector<128x256xf32> to vector<128x256xbf16>
    %c0_6 = arith.constant 0 : index
    %c0_7 = arith.constant 0 : index
    %c0_8 = arith.constant 0 : index
    %11 = vector.load %arg5[%c0_6, %c0_7, %c0_8] : memref<1x128x256xbf16, #tpu.memory_space<vmem>>, vector<1x128x256xbf16>
    %12 = vector.shape_cast %11 : vector<1x128x256xbf16> to vector<128x256xbf16>
    %13 = vector.shape_cast %10 : vector<128x256xbf16> to vector<1x128x256xbf16>
    tpu.vector_store %arg5[%c0_6, %c0_7, %c0_8], %13 {strides = array<i32>} : memref<1x128x256xbf16, #tpu.memory_space<vmem>>, vector<1x128x256xbf16>,
    %14 = vector.extract_strided_slice %7 {offsets = [0, 128], sizes = [256, 128], strides = [1, 1]} : vector<256x256xf32> to vector<256x128xf32>
    %15 = arith.truncf %14 : vector<256x128xf32> to vector<256x128xbf16>
    %c0_9 = arith.constant 0 : index
    %c0_10 = arith.constant 0 : index
    %c0_11 = arith.constant 0 : index
    %16 = vector.load %arg6[%c0_9, %c0_10, %c0_11] : memref<1x256x128xbf16, #tpu.memory_space<vmem>>, vector<1x256x128xbf16>
    %17 = vector.shape_cast %16 : vector<1x256x128xbf16> to vector<256x128xbf16>
    %18 = vector.shape_cast %15 : vector<256x128xbf16> to vector<1x256x128xbf16>
    tpu.vector_store %arg6[%c0_9, %c0_10, %c0_11], %18 {strides = array<i32>} : memref<1x256x128xbf16, #tpu.memory_space<vmem>>, vector<1x256x128xbf16>,
    return
  }
  func.func @transform_0(%arg0: i32, %arg1: i32) -> (i32, i32, i32) {
    %c0_i32 = arith.constant 0 : i32
    %c0_i32_0 = arith.constant 0 : i32
    return %arg0, %arg1, %c0_i32 : i32, i32, i32
  }
  func.func @transform_1(%arg0: i32, %arg1: i32) -> (i32, i32) {
    %c0_i32 = arith.constant 0 : i32
    %c0_i32_0 = arith.constant 0 : i32
    %c0_i32_1 = arith.constant 0 : i32
    return %c0_i32, %c0_i32_0 : i32, i32
  }
  func.func @transform_2(%arg0: i32, %arg1: i32) -> (i32, i32) {
    %c0_i32 = arith.constant 0 : i32
    %c0_i32_0 = arith.constant 0 : i32
    %c0_i32_1 = arith.constant 0 : i32
    return %c0_i32, %c0_i32_0 : i32, i32
  }
  func.func @transform_3(%arg0: i32, %arg1: i32) -> (i32, i32, i32) {
    %c0_i32 = arith.constant 0 : i32
    %c0_i32_0 = arith.constant 0 : i32
    return %arg0, %c0_i32, %arg1 : i32, i32, i32
  }
  func.func @transform_4(%arg0: i32, %arg1: i32) -> (i32, i32, i32) {
    %c0_i32 = arith.constant 0 : i32
    %c0_i32_0 = arith.constant 0 : i32
    return %arg0, %arg1, %c0_i32 : i32, i32, i32
  }
}

</mosaic_0001>

<bundles_post_ra>
// kernel: tpu_custom_call.1
= control target key start
LH: loop header
LB: loop body
LE: loop exit
PB: predicated region body
PF: predicated region fallthrough
CT: control target
= control target key end

     0   :  { %s2181_s0 = inlined_call_operand.hbm [shape: f32[2,256,128], index: 0, kind: input, shape index: {}]   ;;  %s2182_s1 = inlined_call_operand.hbm [shape: bf16[128,256], index: 1, kind: input, shape index: {}]   ;;  %s2183_s2 = inlined_call_operand.vmem [shape: f32[1,256], index: 2, kind: input, shape index: {}]   ;;  %s2184_s3 = inlined_call_operand.hbm [shape: bf16[2,128,256], index: 3, kind: output, shape index: {0}]   ;;  %s2185_s4 = inlined_call_operand.hbm [shape: bf16[2,256,128], index: 4, kind: output, shape index: {1}]  }
   0x1   :  { %2189 = sst [smem:[#allocation14_spill]] %s2182_s1 }
   0x2   :  { %10 = vsyncpa [#allocation3], 0 }
   0x3   :  { %12 = vsyncpa [#allocation3 + $0x1], 0 }
   0x4   :  { %13 = vsyncpa [#allocation6], 0 }
   0x5   :  { %14 = vsyncpa [#allocation4], 0 }
   0x6   :  { %16 = vsyncpa [#allocation4 + $0x1], 0 }
   0x7   :  { %17 = vsyncpa [#allocation9], 0 }
   0x8   :  { %19 = vsyncpa [#allocation9 + $0x1], 0  ;;  %s1796_s15 = smov 0   ;;  %s1798_s16 = smov 0  }
   0x9   :  { %s1800_s17 = smov 0   ;;  %s1802_s18 = smov 0  }
   0xa   :  { %s1804_s19 = smov 0   ;;  %s1806_s20 = smov 0  }
   0xb LB: > { %s1122_s21 = sadd.s32 4294967295, %s1758_s20   ;;  %s1123_s22 = sadd.s32 4294967294, %s1758_s20   ;;  %s1758_s20 = sphi %s1806_s20, %s25_s20   ;;  %s1754_s19 = sphi %s1804_s19, %s2209_s19   ;;  %s1750_s18 = sphi %s1802_s18, %s2208_s18   ;;  %s1746_s17 = sphi %s1800_s17, %s2207_s17   ;;  %s1742_s16 = sphi %s1798_s16, %s2206_s16   ;;  %s1738_s15 = sphi %s1796_s15, %s2205_s15  }
   0xc   : > { %p59_p0 = scmp.ne.s32.totalorder %s1742_s16, %s1738_s15  ;;  %p1830_p1 = scmp.eq.s32.totalorder %s1122_s21, 0 }
   0xd   : > { %p1834_p2 = scmp.eq.s32.totalorder %s1122_s21, 1  ;;  %p133_p3 = scmp.eq.s32.totalorder %s1123_s22, 1 }
   0xe   : > { %p1840_p4 = por %p1830_p1, %p59_p0  ;;  %p1124_p5 = scmp.ge.s32.totalorder %s1758_s20, 1 }
   0xf   : > { %p1845_p6 = por %p133_p3, %p59_p0  ;;  %p168_p7 = scmp.lt.s32.totalorder %s1758_s20, 3 }
  0x10   : > { %s2192_s25 = scalar_select %p1840_p4, 1, 0 }
  0x11   : > { %s2193_s26 = scalar_select %p1845_p6, 1, 0 }
  0x12   : > { %p1850_p8 = pnand %p1124_p5, %p168_p7  ;;  %s1760_s28 = smov [#allocation5]  }
  0x13   : > { %s180_s29 = sshll.u32 %s1760_s28, 4  ;;  %s37_s5 = sadd.s32 1, %s1754_s19  ;;  %s181_s29 = int_to_ptr.vmem [resolvable:$true] %s180_s29 }
  0x14   : > { %p1379_p9 = pneg %p1850_p8  ;;  %s1601_s6 = scalar_lea.vmem %s181_s29, 2048 }
  0x15   : > { %p1602_p13 = scmp.ne.s32.totalorder %s181_s29, %s1601_s6  ;;  %p1609_p5 = scmp.lt.s32.totalorder %s181_s29, %s181_s29 }
  0x16   : > { %p1859_p11 = pnand %p1379_p9, %p1830_p1  ;;  %p1610_p7 = scmp.lt.s32.totalorder %s1601_s6, %s1601_s6 }
  0x18   : > { %p1592_p12 = pneg %p1859_p11  ;;  %p1611_p6 = por %p1610_p7, %p1609_p5 }
  0x1a   : > { %p1604_p0 = pnand %p1602_p13, %p1592_p12 }
  0x1c   : > { %p1605_p3 = pneg %p1604_p0 }
  0x1e   : > { %p1612_p4 = pnand %p1611_p6, %p1605_p3 }
  0x20   : > { %1615 = shalt.err (!%p1612_p4)
}
  0x21   : > { %s2187_s7 = smov 128   ;;  %s2188_s8 = smov 8  }
  0x22   : > { %s2196_s1 = sld [smem:[#allocation14_spill]]  ;;  %p39_p4 = scmp.ge.s32.totalorder %s37_s5, 2 }
  0x23   : > { %s46_s11 = sadd.s32 1, %s1746_s17  ;;  %p53_p6 = scmp.ne.s32.totalorder %s1746_s17, %s1742_s16 }
  0x24   : > { %p54_p9 = scmp.eq.s32.totalorder %s1758_s20, 0  ;;  %s2211_s5 = smov (%p39_p4, %s37_s5), 0 }
  0x25   : > { %p1886_p13 = por %p1834_p2, %p53_p6  ;;  %s41_s14 = ssub.s32 %s1754_s19, %s2211_s5 }
  0x26   : > { %p1880_p12 = por %p54_p9, %p53_p6  ;;  %p1395_p0 = scmp.lt.s32.totalorder %s1758_s20, 2 }
  0x27   : > { %s197_s21 = sand.u32 1, %s1746_s17  }
  0x28   : > { %1382 = dma.hbm_to_vmem [thread:$0]  (!%p1859_p11), %s2196_s1, 2048, %s181_s29, [#allocation6], %s2187_s7, %s2187_s7, %s2188_s8  }
  0x29   : > { %p44_p11 = scmp.eq.s32.totalorder %s41_s14, 0  ;;  %s1127_s22 = sshll.u32 %s197_s21, 8 }
  0x2a   : > { %s1207_s29 = sshll.u32 %s1754_s19, 12  ;;  %s201_s10 = scalar_lea.vmem [#allocation2], %s1127_s22 }
  0x2b   : > { %s1895_s28 = scalar_select %p44_p11, %s1746_s17, %s46_s11  }
  0x2c   : > { %s209_s9 = scalar_lea.hbm %s2181_s0, %s1207_s29  ;;  %s210_s7 = sshll.u32 %s201_s10, 4  ;;  %s211_s7 = int_to_ptr.vmem [resolvable:$true] %s210_s7 }
  0x2d   : > { %p1903_p2 = pnand %p1395_p0, %p1880_p12  ;;  %s198_s8 = scalar_lea.sflag [#allocation3], %s197_s21 }
  0x2e   : > { %s1629_s14 = scalar_lea.vmem %s211_s7, 4096  ;;  %s1763_s11 = smov [#allocation2]  }
  0x2f   : > { %p1618_p3 = pneg %p1903_p2  ;;  %p1630_p5 = scmp.ne.s32.totalorder %s211_s7, %s1629_s14 }
  0x30   : > { %s1634_s1 = sshll.u32 %s1763_s11, 4  ;;  %s1635_s1 = int_to_ptr.vmem [resolvable:$false] %s1634_s1 }
  0x31   : > { %p1632_p7 = pnand %p1630_p5, %p1618_p3  ;;  %s1636_s29 = scalar_lea.vmem %s1635_s1, 8192 }
  0x32   : > { %p1637_p6 = scmp.lt.s32.totalorder %s211_s7, %s1635_s1  ;;  %p1638_p9 = scmp.lt.s32.totalorder %s1636_s29, %s1629_s14 }
  0x33   : > { %p1633_p4 = pneg %p1632_p7 }
  0x34   : > { %p1639_p11 = por %p1638_p9, %p1637_p6 }
  0x36   : > { %p1640_p10 = pnand %p1639_p11, %p1633_p4 }
  0x38   : > { %1643 = shalt.err (!%p1640_p10)
}
  0x39   : > { %s2200_s12 = smov 8   ;;  %s2201_s22 = smov 128  }
  0x3a   : > { %1386 = dma.hbm_to_vmem [thread:$0]  (!%p1903_p2), %s209_s9, 4096, %s211_s7, %s198_s8, %s2201_s22, %s2201_s22, %s2200_s12  }
  0x3b   : > { %222 = sbr.rel (%p1850_p8) target bundleno = 501 (0x1f5), region = 32  ;;  %s1917_s21 = sand.u32 (!%p1850_p8), 1, %s1742_s16  }
  0x3c   : > { %s1131_s1 = sshll.u32 (!%p1850_p8), %s1917_s21, 8  ;;  %s225_s30 = scalar_lea.sflag (!%p1850_p8), [#allocation3], %s1917_s21 }
  0x3d   : > { %s1921_s6 = scalar_lea.vmem (!%p1850_p8), [#allocation2], %s1131_s1  ;;  %p2202_p10 = scmp.ne.s32.totalorder (!%p1850_p8), %s2192_s25, 0 }
  0x40   : > { %1721 = dma.done.wait (%p2202_p10), %s225_s30, 4096  }
  0x41   : > { %1723 = vsyncadd (%p2202_p10), %s225_s30, 4294963200 }
  0x42   : > { %1725 = dma.done.wait (%p1830_p1), [#allocation6], 2048  }
  0x43   : > { %1727 = vsyncadd (%p1830_p1), [#allocation6], 4294965248  ;;  %v1764_v0 = vmov 0   ;;  %v1566_v1 = vld [vmem:[#allocation5 + $0x74] ss:$8 sps:$4 sm:$0xff]   ;;  %v266_v17 = vld [vmem:[%s1921_s6] sm:$0xff] }
  0x44   : > { %454 = vmatprep.mubr.bf16.mxu0 %v1764_v0  ;;  %534 = vmatprep.mubr.bf16.mxu1 %v1764_v0  ;;  %v1568_v2 = vld [vmem:[#allocation5 + $0x70] ss:$8 sps:$4 sm:$0xff]   ;;  %v1569_v3 = vld [vmem:[#allocation5 + $0x64] ss:$8 sps:$4 sm:$0xff]   ;;  %v1571_v4 = vld [vmem:[#allocation5 + $0x60] ss:$8 sps:$4 sm:$0xff]  }
  0x45   : > { %422 = vmatprep.subr.bf16.mxu0 %v1566_v1  ;;  %1353 = vmatprep.subr.bf16.mxu1 %v1566_v1  ;;  %v1572_v5 = vld [vmem:[#allocation5 + $0x54] ss:$8 sps:$4 sm:$0xff]   ;;  %v1574_v6 = vld [vmem:[#allocation5 + $0x50] ss:$8 sps:$4 sm:$0xff]   ;;  %v1575_v7 = vld [vmem:[#allocation5 + $0x44] ss:$8 sps:$4 sm:$0xff]  }
  0x46   : > { %423 = vmatpush1.bf16.msra.mxu0 %v1568_v2  ;;  %1361 = vmatpush1.bf16.msra.mxu1 %v1568_v2  ;;  %v1577_v8 = vld [vmem:[#allocation5 + $0x40] ss:$8 sps:$4 sm:$0xff]   ;;  %v1578_v9 = vld [vmem:[#allocation5 + $0x34] ss:$8 sps:$4 sm:$0xff]   ;;  %v1580_v10 = vld [vmem:[#allocation5 + $0x30] ss:$8 sps:$4 sm:$0xff]   ;;  %v332_v2 = vlaneseq }
  0x47   : > { %424 = vmatprep.subr.bf16.mxu0 %v1569_v3  ;;  %1354 = vmatprep.subr.bf16.mxu1 %v1569_v3  ;;  %v1581_v11 = vld [vmem:[#allocation5 + $0x24] ss:$8 sps:$4 sm:$0xff]   ;;  %v1583_v12 = vld [vmem:[#allocation5 + $0x20] ss:$8 sps:$4 sm:$0xff]   ;;  %v1584_v13 = vld [vmem:[#allocation5 + $0x14] ss:$8 sps:$4 sm:$0xff]  }
  0x48   : > { %v1586_v14 = vld [vmem:[#allocation5 + $0x10] ss:$8 sps:$4 sm:$0xff]   ;;  %v1587_v15 = vld [vmem:[#allocation5 + $0x4] ss:$8 sps:$4 sm:$0xff]   ;;  %v1589_v16 = vld [vmem:[#allocation5] ss:$8 sps:$4 sm:$0xff]  }
  0x49   : > { %v267_v18 = vld [vmem:[%s1921_s6 + $0x8] sm:$0xff]  ;;  %v282_v19 = vld [vmem:[%s1921_s6 + $0x80] sm:$0xff]  ;;  %v268_v23 = vld [vmem:[%s1921_s6 + $0x10] sm:$0xff]  ;;  %v333_v3 = vshrl.u32 %v332_v2, 7  ;;  %s1133_s27 = sshll.u32 %s1917_s21, 7  ;;  %s1256_s8 = sshll.u32 %s1750_s18, 11 }
  0x4a   : > { %425 = vmatpush1.bf16.msra.mxu0 %v1571_v4  ;;  %1362 = vmatpush1.bf16.msra.mxu1 %v1571_v4  ;;  %v283_v20 = vld [vmem:[%s1921_s6 + $0x88] sm:$0xff]  ;;  %v298_v21 = vpack.c.bf16 %v267_v18, %v266_v17  ;;  %v269_v24 = vld [vmem:[%s1921_s6 + $0x18] sm:$0xff]  ;;  %v284_v25 = vld [vmem:[%s1921_s6 + $0x90] sm:$0xff]  ;;  %s1999_s7 = scalar_lea.vmem [#allocation8], %s1133_s27  ;;  %s2077_s24 = scalar_lea.hbm %s2185_s4, %s1256_s8 }
  0x4b   : > { %426 = vmatprep.subr.bf16.mxu0 %v1572_v5  ;;  %1355 = vmatprep.subr.bf16.mxu1 %v1572_v5  ;;  %v306_v22 = vpack.c.bf16 %v283_v20, %v282_v19  ;;  %v285_v26 = vld [vmem:[%s1921_s6 + $0x98] sm:$0xff]  ;;  %v299_v27 = vpack.c.bf16 %v269_v24, %v268_v23  ;;  %v270_v29 = vld [vmem:[%s1921_s6 + $0x20] sm:$0xff]  ;;  %v271_v30 = vld [vmem:[%s1921_s6 + $0x28] sm:$0xff]  ;;  %v334_v4 = vsub.s32 0, %v333_v3  ;;  %s990_s14 = sshll.u32 %s1999_s7, 4  ;;  %s957_s11 = scalar_lea.sflag [#allocation9], %s1917_s21  ;;  %s2080_s14 = int_to_ptr.vmem [resolvable:$true] %s990_s14 }
  0x4c   : > { %v307_v28 = vpack.c.bf16 %v285_v26, %v284_v25  ;;  %v286_v31 = vld [vmem:[%s1921_s6 + $0xa0] sm:$0xff]  ;;  %v287_v32 = vld [vmem:[%s1921_s6 + $0xa8] sm:$0xff]  ;;  %v300_v33 = vpack.c.bf16 %v271_v30, %v270_v29  ;;  %v272_v35 = vld [vmem:[%s1921_s6 + $0x30] sm:$0xff]  ;;  %s1644_s29 = scalar_lea.vmem %s2080_s14, 2048  ;;  %s1765_s12 = smov [#allocation8]  }
  0x4d   : > { %v308_v34 = vpack.c.bf16 %v287_v32, %v286_v31  ;;  %v273_v36 = vld [vmem:[%s1921_s6 + $0x38] sm:$0xff]  ;;  %v288_v37 = vld [vmem:[%s1921_s6 + $0xb0] sm:$0xff]  ;;  %v274_v41 = vld [vmem:[%s1921_s6 + $0x40] sm:$0xff]  ;;  %p1645_p1 = scmp.ne.s32.totalorder %s2080_s14, %s1644_s29  ;;  %s1648_s22 = sshll.u32 %s1765_s12, 4  ;;  %s1649_s22 = int_to_ptr.vmem [resolvable:$false] %s1648_s22 }
  0x4e   : > { %427 = vmatpush1.bf16.msra.mxu0 %v1574_v6  ;;  %1363 = vmatpush1.bf16.msra.mxu1 %v1574_v6  ;;  %v289_v38 = vld [vmem:[%s1921_s6 + $0xb8] sm:$0xff]  ;;  %v301_v39 = vpack.c.bf16 %v273_v36, %v272_v35  ;;  %v275_v42 = vld [vmem:[%s1921_s6 + $0x48] sm:$0xff]  ;;  %v290_v43 = vld [vmem:[%s1921_s6 + $0xc0] sm:$0xff]  ;;  %s1650_s1 = scalar_lea.vmem %s1649_s22, 4096  ;;  %p1651_p0 = scmp.lt.s32.totalorder %s2080_s14, %s1649_s22 }
  0x4f   : > { %428 = vmatprep.subr.bf16.mxu0 %v1575_v7  ;;  %1356 = vmatprep.subr.bf16.mxu1 %v1575_v7  ;;  %v309_v40 = vpack.c.bf16 %v289_v38, %v288_v37  ;;  %v291_v44 = vld [vmem:[%s1921_s6 + $0xc8] sm:$0xff]  ;;  %v302_v45 = vpack.c.bf16 %v275_v42, %v274_v41  ;;  %v276_v47 = vld [vmem:[%s1921_s6 + $0x50] sm:$0xff]  ;;  %v277_v48 = vld [vmem:[%s1921_s6 + $0x58] sm:$0xff]  ;;  %v338_v7 = vsub.s32 1, %v333_v3  ;;  %p1646_p8 = pnand %p1645_p1, %p1886_p13  ;;  %p1652_p2 = scmp.lt.s32.totalorder %s1650_s1, %s1644_s29 }
  0x50   : > { %v310_v46 = vpack.c.bf16 %v291_v44, %v290_v43  ;;  %v292_v49 = vld [vmem:[%s1921_s6 + $0xd0] sm:$0xff]  ;;  %v293_v50 = vld [vmem:[%s1921_s6 + $0xd8] sm:$0xff]  ;;  %v303_v51 = vpack.c.bf16 %v277_v48, %v276_v47  ;;  %v278_v53 = vld [vmem:[%s1921_s6 + $0x60] sm:$0xff] }
  0x51   : > { %v311_v52 = vpack.c.bf16 %v293_v50, %v292_v49  ;;  %v279_v54 = vld [vmem:[%s1921_s6 + $0x68] sm:$0xff]  ;;  %v294_v55 = vld [vmem:[%s1921_s6 + $0xe0] sm:$0xff]  ;;  %v280_v59 = vld [vmem:[%s1921_s6 + $0x70] sm:$0xff]  ;;  %p1647_p12 = pneg %p1646_p8  ;;  %p1653_p3 = por %p1652_p2, %p1651_p0 }
  0x52   : > { %429 = vmatpush1.bf16.msra.mxu0 %v1577_v8  ;;  %1364 = vmatpush1.bf16.msra.mxu1 %v1577_v8  ;;  %v295_v56 = vld [vmem:[%s1921_s6 + $0xe8] sm:$0xff]  ;;  %v304_v57 = vpack.c.bf16 %v279_v54, %v278_v53  ;;  %v281_v60 = vld [vmem:[%s1921_s6 + $0x78] sm:$0xff]  ;;  %v296_v61 = vld [vmem:[%s1921_s6 + $0xf0] sm:$0xff] }
  0x53   : > { %430 = vmatprep.subr.bf16.mxu0 %v1578_v9  ;;  %1357 = vmatprep.subr.bf16.mxu1 %v1578_v9  ;;  %v312_v58 = vpack.c.bf16 %v295_v56, %v294_v55  ;;  %v297_v62 = vld [vmem:[%s1921_s6 + $0xf8] sm:$0xff]  ;;  %v305_v63 = vpack.c.bf16 %v281_v60, %v280_v59  ;;  %v330_v5 = vld [vmem:[%s2183_s2] sm:$0x3]  ;;  %p1654_p5 = pnand %p1653_p3, %p1647_p12 }
  0x54   : > { %v313_v1 = vpack.c.bf16 %v297_v62, %v296_v61  ;;  %v1982_v6 = vrot.slane %v330_v5, %v334_v4 }
  0x56   : > { %431 = vmatpush1.bf16.msra.mxu0 %v1580_v10  ;;  %1365 = vmatpush1.bf16.msra.mxu1 %v1580_v10 }
  0x57   : > { %432 = vmatprep.subr.bf16.mxu0 %v1581_v11  ;;  %1358 = vmatprep.subr.bf16.mxu1 %v1581_v11  ;;  %v1986_v11 = vrot.slane %v330_v5, %v338_v7 }
  0x5a   : > { %433 = vmatpush1.bf16.msra.mxu0 %v1583_v12  ;;  %1366 = vmatpush1.bf16.msra.mxu1 %v1583_v12 }
  0x5b   : > { %434 = vmatprep.subr.bf16.mxu0 %v1584_v13  ;;  %1359 = vmatprep.subr.bf16.mxu1 %v1584_v13 }
  0x5e   : > { %435 = vmatpush1.bf16.msra.mxu0 %v1586_v14  ;;  %1367 = vmatpush1.bf16.msra.mxu1 %v1586_v14 }
  0x5f   : > { %436 = vmatprep.subr.bf16.mxu0 %v1587_v15  ;;  %1360 = vmatprep.subr.bf16.mxu1 %v1587_v15 }
  0x62   : > { %437 = vmatpush1.bf16.msra.mxu0 %v1589_v16  ;;  %1368 = vmatpush1.bf16.msra.mxu1 %v1589_v16 }
  0x65   : > { %455 = vmatmul.mubr.bf16.vlgmr.msra.gmra.mxu0 %v298_v21  ;;  %535 = vmatmul.mubr.bf16.vlgmr.msra.gmra.mxu1 %v306_v22 }
  0x66   : > { %464 = vmatprep.mubr.bf16.mxu0 %v1764_v0  ;;  %544 = vmatprep.mubr.bf16.mxu1 %v1764_v0 }
  0x6d   : > { %465 = vmatmul.mubr.bf16.gmra.mxu0 %v299_v27  ;;  %545 = vmatmul.mubr.bf16.gmra.mxu1 %v307_v28 }
  0x6e   : > { %474 = vmatprep.mubr.bf16.mxu0 %v1764_v0  ;;  %554 = vmatprep.mubr.bf16.mxu1 %v1764_v0 }
  0x75   : > { %475 = vmatmul.mubr.bf16.gmra.mxu0 %v300_v33  ;;  %555 = vmatmul.mubr.bf16.gmra.mxu1 %v308_v34 }
  0x76   : > { %484 = vmatprep.mubr.bf16.mxu0 %v1764_v0  ;;  %564 = vmatprep.mubr.bf16.mxu1 %v1764_v0 }
  0x7d   : > { %485 = vmatmul.mubr.bf16.gmra.mxu0 %v301_v39  ;;  %565 = vmatmul.mubr.bf16.gmra.mxu1 %v309_v40 }
  0x7e   : > { %494 = vmatprep.mubr.bf16.mxu0 %v1764_v0  ;;  %574 = vmatprep.mubr.bf16.mxu1 %v1764_v0 }
  0x85   : > { %495 = vmatmul.mubr.bf16.gmra.mxu0 %v302_v45  ;;  %575 = vmatmul.mubr.bf16.gmra.mxu1 %v310_v46 }
  0x86   : > { %504 = vmatprep.mubr.bf16.mxu0 %v1764_v0  ;;  %584 = vmatprep.mubr.bf16.mxu1 %v1764_v0 }
  0x8d   : > { %505 = vmatmul.mubr.bf16.gmra.mxu0 %v303_v51  ;;  %585 = vmatmul.mubr.bf16.gmra.mxu1 %v311_v52 }
  0x8e   : > { %514 = vmatprep.mubr.bf16.mxu0 %v1764_v0  ;;  %594 = vmatprep.mubr.bf16.mxu1 %v1764_v0 }
  0x95   : > { %515 = vmatmul.mubr.bf16.gmra.mxu0 %v304_v57  ;;  %595 = vmatmul.mubr.bf16.gmra.mxu1 %v312_v58 }
  0x96   : > { %524 = vmatprep.mubr.bf16.mxu0 %v1764_v0  ;;  %604 = vmatprep.mubr.bf16.mxu1 %v1764_v0 }
  0x9d   : > { %525 = vmatmul.mubr.bf16.gmra.mxu0 %v305_v63  ;;  %605 = vmatmul.mubr.bf16.gmra.mxu1 %v313_v1 }
 0x125   : > { %v456_v8 = vpop.f32.mrf.mxu0  ;;  %v536_v0 = vpop.f32.mrf.mxu1 }
 0x126   : > { %v457_v9 = vadd.f32 %v456_v8, %v1982_v6  ;;  %v537_v10 = vadd.f32 %v536_v0, %v1982_v6 }
 0x127   : > { %v458_v12 = vpop.f32.mrf.mxu0  ;;  %v538_v13 = vpop.f32.mrf.mxu1 }
 0x128   : > { %v1454_v14 = vpack.i.bf16 %v537_v10, %v457_v9  ;;  %v459_v19 = vadd.f32 %v458_v12, %v1986_v11  ;;  %v539_v22 = vadd.f32 %v538_v13, %v1986_v11 }
 0x129   : > { %v460_v15 = vpop.f32.mrf.mxu0  ;;  %v540_v16 = vpop.f32.mrf.mxu1 }
 0x12a   : > { %v461_v17 = vadd.f32 %v460_v15, %v1982_v6  ;;  %v541_v18 = vadd.f32 %v540_v16, %v1982_v6  ;;  %1455 = vxpose.xlu0.b32.start [1/16] %v1454_v14, 128 }
 0x12b   : > { %v462_v20 = vpop.f32.mrf.mxu0  ;;  %v542_v21 = vpop.f32.mrf.mxu1 }
 0x12c   : > { %v463_v23 = vadd.f32 %v462_v20, %v1986_v11  ;;  %v543_v24 = vadd.f32 %v542_v21, %v1986_v11  ;;  %v1456_v25 = vpack.i.bf16 %v541_v18, %v461_v17 }
 0x12d   : > { %v466_v26 = vpop.f32.mrf.mxu0  ;;  %v546_v27 = vpop.f32.mrf.mxu1 }
 0x12e   : > { %v1261_v28 = vpack.c.bf16 %v463_v23, %v459_v19  ;;  %v1301_v29 = vpack.c.bf16 %v543_v24, %v539_v22  ;;  %v467_v30 = vadd.f32 %v466_v26, %v1982_v6  ;;  %v547_v31 = vadd.f32 %v546_v27, %v1982_v6  ;;  %1457 = vxpose.xlu0.b32.cont [2/16] %v1456_v25, 128 }
 0x12f   : > { %v468_v32 = vpop.f32.mrf.mxu0  ;;  %v548_v33 = vpop.f32.mrf.mxu1 }
 0x130   : > { %1262 = vst [vmem:[%s1999_s7] sm:$0xff] %v1261_v28   ;;  %1345 = vst [vmem:[%s1999_s7 + $0x40] sm:$0xff] %v1301_v29   ;;  %v1458_v34 = vpack.i.bf16 %v547_v31, %v467_v30  ;;  %v469_v39 = vadd.f32 %v468_v32, %v1986_v11  ;;  %v549_v42 = vadd.f32 %v548_v33, %v1986_v11 }
 0x131   : > { %v470_v35 = vpop.f32.mrf.mxu0  ;;  %v550_v36 = vpop.f32.mrf.mxu1 }
 0x132   : > { %v471_v37 = vadd.f32 %v470_v35, %v1982_v6  ;;  %v551_v38 = vadd.f32 %v550_v36, %v1982_v6  ;;  %1459 = vxpose.xlu0.b32.cont [3/16] %v1458_v34, 128 }
 0x133   : > { %v472_v40 = vpop.f32.mrf.mxu0  ;;  %v552_v41 = vpop.f32.mrf.mxu1 }
 0x134   : > { %v473_v43 = vadd.f32 %v472_v40, %v1986_v11  ;;  %v553_v44 = vadd.f32 %v552_v41, %v1986_v11  ;;  %v1460_v45 = vpack.i.bf16 %v551_v38, %v471_v37 }
 0x135   : > { %v476_v46 = vpop.f32.mrf.mxu0  ;;  %v556_v47 = vpop.f32.mrf.mxu1 }
 0x136   : > { %v1266_v48 = vpack.c.bf16 %v473_v43, %v469_v39  ;;  %v1306_v49 = vpack.c.bf16 %v553_v44, %v549_v42  ;;  %v477_v50 = vadd.f32 %v476_v46, %v1982_v6  ;;  %v557_v51 = vadd.f32 %v556_v47, %v1982_v6  ;;  %1461 = vxpose.xlu0.b32.cont [4/16] %v1460_v45, 128 }
 0x137   : > { %v478_v52 = vpop.f32.mrf.mxu0  ;;  %v558_v53 = vpop.f32.mrf.mxu1 }
 0x138   : > { %1338 = vst [vmem:[%s1999_s7 + $0x8] sm:$0xff] %v1266_v48   ;;  %1346 = vst [vmem:[%s1999_s7 + $0x48] sm:$0xff] %v1306_v49   ;;  %v1462_v54 = vpack.i.bf16 %v557_v51, %v477_v50  ;;  %v479_v59 = vadd.f32 %v478_v52, %v1986_v11  ;;  %v559_v62 = vadd.f32 %v558_v53, %v1986_v11 }
 0x139   : > { %v480_v55 = vpop.f32.mrf.mxu0  ;;  %v560_v56 = vpop.f32.mrf.mxu1 }
 0x13a   : > { %v481_v57 = vadd.f32 %v480_v55, %v1982_v6  ;;  %v561_v58 = vadd.f32 %v560_v56, %v1982_v6  ;;  %1463 = vxpose.xlu0.b32.cont [5/16] %v1462_v54, 128 }
 0x13b   : > { %v482_v60 = vpop.f32.mrf.mxu0  ;;  %v562_v61 = vpop.f32.mrf.mxu1 }
 0x13c   : > { %v483_v63 = vadd.f32 %v482_v60, %v1986_v11  ;;  %v563_v1 = vadd.f32 %v562_v61, %v1986_v11  ;;  %v1464_v2 = vpack.i.bf16 %v561_v58, %v481_v57 }
 0x13d   : > { %v486_v3 = vpop.f32.mrf.mxu0  ;;  %v566_v4 = vpop.f32.mrf.mxu1 }
 0x13e   : > { %v1271_v5 = vpack.c.bf16 %v483_v63, %v479_v59  ;;  %v1311_v7 = vpack.c.bf16 %v563_v1, %v559_v62  ;;  %v487_v8 = vadd.f32 %v486_v3, %v1982_v6  ;;  %v567_v0 = vadd.f32 %v566_v4, %v1982_v6  ;;  %1465 = vxpose.xlu0.b32.cont [6/16] %v1464_v2, 128 }
 0x13f   : > { %v488_v9 = vpop.f32.mrf.mxu0  ;;  %v568_v10 = vpop.f32.mrf.mxu1 }
 0x140   : > { %1339 = vst [vmem:[%s1999_s7 + $0x10] sm:$0xff] %v1271_v5   ;;  %1347 = vst [vmem:[%s1999_s7 + $0x50] sm:$0xff] %v1311_v7   ;;  %v1466_v12 = vpack.i.bf16 %v567_v0, %v487_v8  ;;  %v489_v17 = vadd.f32 %v488_v9, %v1986_v11  ;;  %v569_v20 = vadd.f32 %v568_v10, %v1986_v11 }
 0x141   : > { %v490_v13 = vpop.f32.mrf.mxu0  ;;  %v570_v14 = vpop.f32.mrf.mxu1 }
 0x142   : > { %v491_v15 = vadd.f32 %v490_v13, %v1982_v6  ;;  %v571_v16 = vadd.f32 %v570_v14, %v1982_v6  ;;  %1467 = vxpose.xlu0.b32.cont [7/16] %v1466_v12, 128 }
 0x143   : > { %v492_v18 = vpop.f32.mrf.mxu0  ;;  %v572_v19 = vpop.f32.mrf.mxu1 }
 0x144   : > { %v493_v21 = vadd.f32 %v492_v18, %v1986_v11  ;;  %v573_v22 = vadd.f32 %v572_v19, %v1986_v11  ;;  %v1468_v23 = vpack.i.bf16 %v571_v16, %v491_v15 }
 0x145   : > { %v496_v24 = vpop.f32.mrf.mxu0  ;;  %v576_v25 = vpop.f32.mrf.mxu1 }
 0x146   : > { %v1276_v26 = vpack.c.bf16 %v493_v21, %v489_v17  ;;  %v1316_v27 = vpack.c.bf16 %v573_v22, %v569_v20  ;;  %v497_v28 = vadd.f32 %v496_v24, %v1982_v6  ;;  %v577_v29 = vadd.f32 %v576_v25, %v1982_v6  ;;  %1469 = vxpose.xlu0.b32.cont [8/16] %v1468_v23, 128 }
 0x147   : > { %v498_v30 = vpop.f32.mrf.mxu0  ;;  %v578_v31 = vpop.f32.mrf.mxu1 }
 0x148   : > { %1340 = vst [vmem:[%s1999_s7 + $0x18] sm:$0xff] %v1276_v26   ;;  %1348 = vst [vmem:[%s1999_s7 + $0x58] sm:$0xff] %v1316_v27   ;;  %v1470_v32 = vpack.i.bf16 %v577_v29, %v497_v28  ;;  %v499_v37 = vadd.f32 %v498_v30, %v1986_v11  ;;  %v579_v40 = vadd.f32 %v578_v31, %v1986_v11 }
 0x149   : > { %v500_v33 = vpop.f32.mrf.mxu0  ;;  %v580_v34 = vpop.f32.mrf.mxu1 }
 0x14a   : > { %v501_v35 = vadd.f32 %v500_v33, %v1982_v6  ;;  %v581_v36 = vadd.f32 %v580_v34, %v1982_v6  ;;  %1471 = vxpose.xlu0.b32.cont [9/16] %v1470_v32, 128 }
 0x14b   : > { %v502_v38 = vpop.f32.mrf.mxu0  ;;  %v582_v39 = vpop.f32.mrf.mxu1 }
 0x14c   : > { %v503_v41 = vadd.f32 %v502_v38, %v1986_v11  ;;  %v583_v42 = vadd.f32 %v582_v39, %v1986_v11  ;;  %v1472_v43 = vpack.i.bf16 %v581_v36, %v501_v35 }
 0x14d   : > { %v506_v44 = vpop.f32.mrf.mxu0  ;;  %v586_v45 = vpop.f32.mrf.mxu1 }
 0x14e   : > { %v1281_v46 = vpack.c.bf16 %v503_v41, %v499_v37  ;;  %v1321_v47 = vpack.c.bf16 %v583_v42, %v579_v40  ;;  %v507_v48 = vadd.f32 %v506_v44, %v1982_v6  ;;  %v587_v49 = vadd.f32 %v586_v45, %v1982_v6  ;;  %1473 = vxpose.xlu0.b32.cont [10/16] %v1472_v43, 128 }
 0x14f   : > { %v508_v50 = vpop.f32.mrf.mxu0  ;;  %v588_v51 = vpop.f32.mrf.mxu1 }
 0x150   : > { %1341 = vst [vmem:[%s1999_s7 + $0x20] sm:$0xff] %v1281_v46   ;;  %1349 = vst [vmem:[%s1999_s7 + $0x60] sm:$0xff] %v1321_v47   ;;  %v1474_v52 = vpack.i.bf16 %v587_v49, %v507_v48  ;;  %v509_v57 = vadd.f32 %v508_v50, %v1986_v11  ;;  %v589_v60 = vadd.f32 %v588_v51, %v1986_v11 }
 0x151   : > { %v510_v53 = vpop.f32.mrf.mxu0  ;;  %v590_v54 = vpop.f32.mrf.mxu1 }
 0x152   : > { %v511_v55 = vadd.f32 %v510_v53, %v1982_v6  ;;  %v591_v56 = vadd.f32 %v590_v54, %v1982_v6  ;;  %1475 = vxpose.xlu0.b32.cont [11/16] %v1474_v52, 128 }
 0x153   : > { %v512_v58 = vpop.f32.mrf.mxu0  ;;  %v592_v59 = vpop.f32.mrf.mxu1 }
 0x154   : > { %v513_v61 = vadd.f32 %v512_v58, %v1986_v11  ;;  %v593_v62 = vadd.f32 %v592_v59, %v1986_v11  ;;  %v1476_v63 = vpack.i.bf16 %v591_v56, %v511_v55 }
 0x155   : > { %v516_v1 = vpop.f32.mrf.mxu0  ;;  %v596_v2 = vpop.f32.mrf.mxu1 }
 0x156   : > { %v1286_v3 = vpack.c.bf16 %v513_v61, %v509_v57  ;;  %v1326_v4 = vpack.c.bf16 %v593_v62, %v589_v60  ;;  %v517_v5 = vadd.f32 %v516_v1, %v1982_v6  ;;  %v597_v7 = vadd.f32 %v596_v2, %v1982_v6  ;;  %1477 = vxpose.xlu0.b32.cont [12/16] %v1476_v63, 128 }
 0x157   : > { %v518_v8 = vpop.f32.mrf.mxu0  ;;  %v598_v0 = vpop.f32.mrf.mxu1 }
 0x158   : > { %1342 = vst [vmem:[%s1999_s7 + $0x28] sm:$0xff] %v1286_v3   ;;  %1350 = vst [vmem:[%s1999_s7 + $0x68] sm:$0xff] %v1326_v4   ;;  %v1478_v9 = vpack.i.bf16 %v597_v7, %v517_v5  ;;  %v519_v15 = vadd.f32 %v518_v8, %v1986_v11  ;;  %v599_v18 = vadd.f32 %v598_v0, %v1986_v11 }
 0x159   : > { %v520_v10 = vpop.f32.mrf.mxu0  ;;  %v600_v12 = vpop.f32.mrf.mxu1 }
 0x15a   : > { %v521_v13 = vadd.f32 %v520_v10, %v1982_v6  ;;  %v601_v14 = vadd.f32 %v600_v12, %v1982_v6  ;;  %1479 = vxpose.xlu0.b32.cont [13/16] %v1478_v9, 128 }
 0x15b   : > { %v522_v16 = vpop.f32.mrf.mxu0  ;;  %v602_v17 = vpop.f32.mrf.mxu1 }
 0x15c   : > { %v523_v19 = vadd.f32 %v522_v16, %v1986_v11  ;;  %v603_v20 = vadd.f32 %v602_v17, %v1986_v11  ;;  %v1480_v21 = vpack.i.bf16 %v601_v14, %v521_v13 }
 0x15d   : > { %v526_v22 = vpop.f32.mrf.mxu0  ;;  %v606_v23 = vpop.f32.mrf.mxu1 }
 0x15e   : > { %v1291_v24 = vpack.c.bf16 %v523_v19, %v519_v15  ;;  %v1331_v25 = vpack.c.bf16 %v603_v20, %v599_v18  ;;  %v527_v26 = vadd.f32 %v526_v22, %v1982_v6  ;;  %v607_v27 = vadd.f32 %v606_v23, %v1982_v6  ;;  %1481 = vxpose.xlu0.b32.cont [14/16] %v1480_v21, 128 }
 0x15f   : > { %v528_v28 = vpop.f32.mrf.mxu0  ;;  %v608_v29 = vpop.f32.mrf.mxu1 }
 0x160   : > { %1343 = vst [vmem:[%s1999_s7 + $0x30] sm:$0xff] %v1291_v24   ;;  %1351 = vst [vmem:[%s1999_s7 + $0x70] sm:$0xff] %v1331_v25   ;;  %v1482_v30 = vpack.i.bf16 %v607_v27, %v527_v26  ;;  %v529_v35 = vadd.f32 %v528_v28, %v1986_v11  ;;  %v609_v38 = vadd.f32 %v608_v29, %v1986_v11 }
 0x161   : > { %v530_v31 = vpop.f32.mrf.mxu0  ;;  %v610_v32 = vpop.f32.mrf.mxu1 }
 0x162   : > { %v531_v33 = vadd.f32 %v530_v31, %v1982_v6  ;;  %v611_v34 = vadd.f32 %v610_v32, %v1982_v6  ;;  %1483 = vxpose.xlu0.b32.cont [15/16] %v1482_v30, 128 }
 0x163   : > { %v532_v36 = vpop.f32.mrf.mxu0  ;;  %v612_v37 = vpop.f32.mrf.mxu1 }
 0x164   : > { %v533_v39 = vadd.f32 %v532_v36, %v1986_v11  ;;  %v613_v40 = vadd.f32 %v612_v37, %v1986_v11  ;;  %v1484_v41 = vpack.i.bf16 %v611_v34, %v531_v33 }
 0x166   : > { %v1296_v42 = vpack.c.bf16 %v533_v39, %v529_v35  ;;  %v1336_v43 = vpack.c.bf16 %v613_v40, %v609_v38  ;;  %1485 = vxpose.xlu0.b32.end [16/16] %v1484_v41, 128 }
 0x168   : > { %1344 = vst [vmem:[%s1999_s7 + $0x38] sm:$0xff] %v1296_v42   ;;  %1352 = vst [vmem:[%s1999_s7 + $0x78] sm:$0xff] %v1336_v43  }
 0x169   : > { %1657 = shalt.err (!%p1654_p5)
}
 0x16a   : > { %s1658_s30 = scalar_lea.hbm %s2077_s24, 2048  ;;  %s1662_s25 = scalar_lea.hbm %s2185_s4, 4096 }
 0x16b   : > { %p1659_p7 = scmp.ne.s32.totalorder %s2077_s24, %s1658_s30  ;;  %p1663_p9 = scmp.lt.s32.totalorder %s2077_s24, %s2185_s4 }
 0x16c   : > { %p1664_p11 = scmp.lt.s32.totalorder %s1662_s25, %s1658_s30 }
 0x16d   : > { %p1660_p4 = pnand %p1659_p7, %p1886_p13 }
 0x16e   : > { %p1665_p10 = por %p1664_p11, %p1663_p9 }
 0x16f   : > { %p1661_p6 = pneg %p1660_p4 }
 0x171   : > { %p1666_p1 = pnand %p1665_p10, %p1661_p6 }
 0x173   : > { %1669 = shalt.err (!%p1666_p1)
}
 0x174   : > { %s1766_s10 = smov 64   ;;  %s1767_s29 = smov 4  }
 0x175   : > { %1376 = dma.vmem_to_hbm [thread:$0]  (%p1886_p13), %s2080_s14, 2048, %s2077_s24, %s957_s11, %s1766_s10, %s1766_s10, %s1767_s29  }
 0x176   : > { %s2107_s12 = scalar_lea.vmem [#allocation7], %s1133_s27  ;;  %s2130_s11 = scalar_lea.hbm %s2184_s3, %s1256_s8 }
 0x177   : > { %s972_s27 = sshll.u32 %s2107_s12, 4  ;;  %s952_s22 = scalar_lea.sflag [#allocation4], %s1917_s21  ;;  %s2132_s27 = int_to_ptr.vmem [resolvable:$true] %s972_s27 }
 0x178   : > { %s1670_s1 = scalar_lea.vmem %s2132_s27, 2048  ;;  %s1768_s30 = smov [#allocation7]  }
 0x179   : > { %p1671_p8 = scmp.ne.s32.totalorder %s2132_s27, %s1670_s1  ;;  %s1674_s18 = sshll.u32 %s1768_s30, 4  ;;  %s1675_s18 = int_to_ptr.vmem [resolvable:$false] %s1674_s18 }
 0x17a   : > { %s1676_s6 = scalar_lea.vmem %s1675_s18, 4096  ;;  %p1677_p2 = scmp.lt.s32.totalorder %s2132_s27, %s1675_s18 }
 0x17b   : > { %p1672_p12 = pnand %p1671_p8, %p1886_p13  ;;  %p1678_p3 = scmp.lt.s32.totalorder %s1676_s6, %s1670_s1 }
 0x17d   : > { %p1673_p0 = pneg %p1672_p12  ;;  %p1679_p5 = por %p1678_p3, %p1677_p2 }
 0x17f   : > { %p1680_p7 = pnand %p1679_p5, %p1673_p0 }
 0x1a6   : > { %v1486_v6 = vpop.trf.xlu0 }
 0x1a7   : > { %v1490_v11 = vunpack.i.h.bf16 %v1486_v6  ;;  %v1487_v44 = vunpack.i.l.bf16 %v1486_v6 }
 0x1a9   : > { %v1208_v45 = vpack.c.bf16 %v1490_v11, %v1487_v44 }
 0x1aa   : > { %v1491_v46 = vpop.trf.xlu0 }
 0x1ab   : > { %775 = vst [vmem:[%s2107_s12] sm:$0xff] %v1208_v45  ;;  %v1495_v47 = vunpack.i.h.bf16 %v1491_v46  ;;  %v1492_v48 = vunpack.i.l.bf16 %v1491_v46 }
 0x1ad   : > { %v1209_v49 = vpack.c.bf16 %v1495_v47, %v1492_v48 }
 0x1ae   : > { %v1496_v50 = vpop.trf.xlu0 }
 0x1af   : > { %776 = vst [vmem:[%s2107_s12 + $0x8] sm:$0xff] %v1209_v49  ;;  %v1500_v51 = vunpack.i.h.bf16 %v1496_v50  ;;  %v1497_v52 = vunpack.i.l.bf16 %v1496_v50 }
 0x1b1   : > { %v1210_v53 = vpack.c.bf16 %v1500_v51, %v1497_v52 }
 0x1b2   : > { %v1501_v54 = vpop.trf.xlu0 }
 0x1b3   : > { %777 = vst [vmem:[%s2107_s12 + $0x10] sm:$0xff] %v1210_v53  ;;  %v1505_v55 = vunpack.i.h.bf16 %v1501_v54  ;;  %v1502_v56 = vunpack.i.l.bf16 %v1501_v54 }
 0x1b5   : > { %v1211_v57 = vpack.c.bf16 %v1505_v55, %v1502_v56 }
 0x1b6   : > { %v1506_v58 = vpop.trf.xlu0 }
 0x1b7   : > { %778 = vst [vmem:[%s2107_s12 + $0x18] sm:$0xff] %v1211_v57  ;;  %v1510_v59 = vunpack.i.h.bf16 %v1506_v58  ;;  %v1507_v60 = vunpack.i.l.bf16 %v1506_v58 }
 0x1b9   : > { %v1212_v61 = vpack.c.bf16 %v1510_v59, %v1507_v60 }
 0x1ba   : > { %v1511_v62 = vpop.trf.xlu0 }
 0x1bb   : > { %779 = vst [vmem:[%s2107_s12 + $0x20] sm:$0xff] %v1212_v61  ;;  %v1515_v63 = vunpack.i.h.bf16 %v1511_v62  ;;  %v1512_v1 = vunpack.i.l.bf16 %v1511_v62 }
 0x1bd   : > { %v1213_v2 = vpack.c.bf16 %v1515_v63, %v1512_v1 }
 0x1be   : > { %v1516_v3 = vpop.trf.xlu0 }
 0x1bf   : > { %780 = vst [vmem:[%s2107_s12 + $0x28] sm:$0xff] %v1213_v2  ;;  %v1520_v4 = vunpack.i.h.bf16 %v1516_v3  ;;  %v1517_v5 = vunpack.i.l.bf16 %v1516_v3 }
 0x1c1   : > { %v1214_v7 = vpack.c.bf16 %v1520_v4, %v1517_v5 }
 0x1c2   : > { %v1521_v8 = vpop.trf.xlu0 }
 0x1c3   : > { %781 = vst [vmem:[%s2107_s12 + $0x30] sm:$0xff] %v1214_v7  ;;  %v1525_v0 = vunpack.i.h.bf16 %v1521_v8  ;;  %v1522_v9 = vunpack.i.l.bf16 %v1521_v8 }
 0x1c5   : > { %v1215_v10 = vpack.c.bf16 %v1525_v0, %v1522_v9 }
 0x1c6   : > { %v1526_v12 = vpop.trf.xlu0 }
 0x1c7   : > { %782 = vst [vmem:[%s2107_s12 + $0x38] sm:$0xff] %v1215_v10  ;;  %v1530_v13 = vunpack.i.h.bf16 %v1526_v12  ;;  %v1527_v14 = vunpack.i.l.bf16 %v1526_v12 }
 0x1c9   : > { %v1216_v15 = vpack.c.bf16 %v1530_v13, %v1527_v14 }
 0x1ca   : > { %v1531_v16 = vpop.trf.xlu0 }
 0x1cb   : > { %783 = vst [vmem:[%s2107_s12 + $0x40] sm:$0xff] %v1216_v15  ;;  %v1535_v17 = vunpack.i.h.bf16 %v1531_v16  ;;  %v1532_v18 = vunpack.i.l.bf16 %v1531_v16 }
 0x1cd   : > { %v1217_v19 = vpack.c.bf16 %v1535_v17, %v1532_v18 }
 0x1ce   : > { %v1536_v20 = vpop.trf.xlu0 }
 0x1cf   : > { %784 = vst [vmem:[%s2107_s12 + $0x48] sm:$0xff] %v1217_v19  ;;  %v1540_v21 = vunpack.i.h.bf16 %v1536_v20  ;;  %v1537_v22 = vunpack.i.l.bf16 %v1536_v20 }
 0x1d1   : > { %v1218_v23 = vpack.c.bf16 %v1540_v21, %v1537_v22 }
 0x1d2   : > { %v1541_v24 = vpop.trf.xlu0 }
 0x1d3   : > { %785 = vst [vmem:[%s2107_s12 + $0x50] sm:$0xff] %v1218_v23  ;;  %v1545_v25 = vunpack.i.h.bf16 %v1541_v24  ;;  %v1542_v26 = vunpack.i.l.bf16 %v1541_v24 }
 0x1d5   : > { %v1219_v27 = vpack.c.bf16 %v1545_v25, %v1542_v26 }
 0x1d6   : > { %v1546_v28 = vpop.trf.xlu0 }
 0x1d7   : > { %786 = vst [vmem:[%s2107_s12 + $0x58] sm:$0xff] %v1219_v27  ;;  %v1550_v29 = vunpack.i.h.bf16 %v1546_v28  ;;  %v1547_v30 = vunpack.i.l.bf16 %v1546_v28 }
 0x1d9   : > { %v1220_v31 = vpack.c.bf16 %v1550_v29, %v1547_v30 }
 0x1da   : > { %v1551_v32 = vpop.trf.xlu0 }
 0x1db   : > { %787 = vst [vmem:[%s2107_s12 + $0x60] sm:$0xff] %v1220_v31  ;;  %v1555_v33 = vunpack.i.h.bf16 %v1551_v32  ;;  %v1552_v34 = vunpack.i.l.bf16 %v1551_v32 }
 0x1dd   : > { %v1221_v35 = vpack.c.bf16 %v1555_v33, %v1552_v34 }
 0x1de   : > { %v1556_v36 = vpop.trf.xlu0 }
 0x1df   : > { %788 = vst [vmem:[%s2107_s12 + $0x68] sm:$0xff] %v1221_v35  ;;  %v1560_v37 = vunpack.i.h.bf16 %v1556_v36  ;;  %v1557_v38 = vunpack.i.l.bf16 %v1556_v36 }
 0x1e1   : > { %v1222_v39 = vpack.c.bf16 %v1560_v37, %v1557_v38 }
 0x1e2   : > { %v1561_v40 = vpop.trf.xlu0 }
 0x1e3   : > { %789 = vst [vmem:[%s2107_s12 + $0x70] sm:$0xff] %v1222_v39  ;;  %v1565_v41 = vunpack.i.h.bf16 %v1561_v40  ;;  %v1562_v42 = vunpack.i.l.bf16 %v1561_v40 }
 0x1e5   : > { %v1223_v43 = vpack.c.bf16 %v1565_v41, %v1562_v42 }
 0x1e7   : > { %790 = vst [vmem:[%s2107_s12 + $0x78] sm:$0xff] %v1223_v43 }
 0x1e8   : > { %1683 = shalt.err (!%p1680_p7)
}
 0x1e9   : > { %s1684_s8 = scalar_lea.hbm %s2130_s11, 2048  ;;  %s1688_s7 = scalar_lea.hbm %s2184_s3, 4096 }
 0x1ea   : > { %p1685_p4 = scmp.ne.s32.totalorder %s2130_s11, %s1684_s8  ;;  %p1689_p11 = scmp.lt.s32.totalorder %s2130_s11, %s2184_s3 }
 0x1eb   : > { %p1690_p10 = scmp.lt.s32.totalorder %s1688_s7, %s1684_s8 }
 0x1ec   : > { %p1686_p6 = pnand %p1685_p4, %p1886_p13 }
 0x1ed   : > { %p1691_p1 = por %p1690_p10, %p1689_p11 }
 0x1ee   : > { %p1687_p9 = pneg %p1686_p6 }
 0x1f0   : > { %p1692_p8 = pnand %p1691_p1, %p1687_p9 }
 0x1f2   : > { %1695 = shalt.err (!%p1692_p8)
}
 0x1f3   : > { %s1769_s29 = smov 128   ;;  %s1770_s12 = smov 8  }
 0x1f4   : > { %1375 = dma.vmem_to_hbm [thread:$0]  (%p1886_p13), %s2132_s27, 2048, %s2130_s11, %s952_s22, %s1769_s29, %s1769_s29, %s1770_s12  }
 0x1f5 PF: > { %s1005_s24 = sand.u32 1, %s1738_s15   ;;  %p2203_p12 = scmp.ne.s32.totalorder %s2193_s26, 0 }
 0x1f6   : > { %p2204_p0 = scmp.ge.s32.totalorder %s1758_s20, 2  ;;  %s1006_s14 = scalar_lea.sflag [#allocation4], %s1005_s24 }
 0x1f8   : > { %p1388_p2 = pnand %p2204_p0, %p2203_p12 }
 0x1fa   : > { %p1389_p3 = pneg %p1388_p2 }
 0x1fc   : > { %1729 = dma.done.wait (%p1389_p3), %s1006_s14, 2048  }
 0x1fd   : > { %1731 = vsyncadd (%p1389_p3), %s1006_s14, 4294965248  ;;  %s1015_s1 = scalar_lea.sflag [#allocation9], %s1005_s24 }
 0x1fe   : > { %1733 = dma.done.wait (%p1389_p3), %s1015_s1, 2048  }
 0x1ff   : > { %1735 = vsyncadd (%p1389_p3), %s1015_s1, 4294965248  ;;  %s25_s20 = sadd.s32 1, %s1758_s20   ;;  %s2205_s15 = smov %s1742_s16 }
 0x200   : > { %p22_p5 = scmp.ge.s32.totalorder %s25_s20, 4   ;;  %s2206_s16 = smov %s1746_s17 }
 0x201   : > { %s2207_s17 = smov %s1895_s28  ;;  %s2208_s18 = smov %s1754_s19 }
 0x202   : > { %s2209_s19 = smov %s2211_s5  ;;  %24 = sbr.rel (!%p22_p5) target bundleno = 11 (0xb), region = 98 }
 0x207   :  { %1020 = vsyncpa [#allocation3], 1 }
 0x208   :  { %1022 = vsyncpa [#allocation3 + $0x1], 1 }
 0x209   :  { %1023 = vsyncpa [#allocation6], 1 }
 0x20a   :  { %1024 = vsyncpa [#allocation4], 1 }
 0x20b   :  { %1026 = vsyncpa [#allocation4 + $0x1], 1 }
 0x20c   :  { %1027 = vsyncpa [#allocation9], 1 }
 0x20d   :  { %1029 = vsyncpa [#allocation9 + $0x1], 1 }

</bundles_post_ra>
